<compile_context>
chip_gen: v7x
topology: tpu7x:2x2x1
jax: 0.10.0
libtpu: 0.0.40
codegen_flags: <defaults>
</compile_context>

<pallas_src>
import functools

import jax
import jax.numpy as jnp
from jax.experimental import pallas as pl
from jax.experimental.pallas import tpu as pltpu


def _round_up(x, m):
    return ((x + m - 1) // m) * m


def _cdiv(a, b):
    return -(-a // b)


def _fuzzy_layer_kernel(x_ref, params_ref, o_ref, *, num_in, maxmfs):
    """One batch-lane tile of the fuzzification layer (sublane-collapsed).

    x_ref:      [num_in, TB]   VMEM  (batch on lanes)
    params_ref: [3, P, 1]      VMEM  (P = num_in*maxmfs; resident, batch-invariant)
                params[0] = mu, params[1] = -1/(2*sigma^2), params[2] = pad mask
    o_ref:      [P, TB]        VMEM  (dense sublanes -> lane-dense unmasked stores)
    """
    tb = x_ref.shape[-1]
    x = x_ref[...]                                            # [num_in, TB]

    # Replicate each input-variable row maxmfs times along sublanes so the
    # (variable, mf) pair occupies one dense sublane axis of size P.
    # broadcast + concat is cheap XLU/VPU work; num_in/maxmfs are tiny statics.
    xr = jnp.concatenate(
        [jnp.broadcast_to(x[i:i + 1, :], (maxmfs, tb)) for i in range(num_in)],
        axis=0)                                               # [P, TB]

    mu = params_ref[0]                                        # [P, 1] (lane broadcast)
    neg_inv2v = params_ref[1]                                 # -1/(2*sigma^2)
    mask = params_ref[2]                                      # 1 = real mf, 0 = padding

    d = xr - mu
    # GaussMemberFunc + zero padding; math in f32, cast only at the store.
    o_ref[...] = (jnp.exp(d * d * neg_inv2v) * mask).astype(o_ref.dtype)


def _plan_batch_tiling(B, P, out_dsize, target_block_bytes, max_tb=65536):
    """Pick (tb, grid, padded_B): ~target-sized output blocks, >=2 steps for v7x."""
    bp = _round_up(B, 128)
    tb_cap = max(128, min(max_tb,
                          (target_block_bytes // max(P * out_dsize, 1)) // 128 * 128))
    grid = max(1, _cdiv(bp, tb_cap))
    if grid == 1 and bp > 128:
        grid = 2          # let the "parallel" axis shard across both v7x TensorCores
    tb = _round_up(_cdiv(bp, grid), 128)
    return tb, grid, tb * grid


@functools.partial(jax.jit,
                   static_argnames=("layout", "out_dtype", "target_block_bytes"))
def fuzzy_layer_forward(x, mu, sigma, mask, *, layout="module",
                        out_dtype=jnp.float32,
                        target_block_bytes=2 * 1024 * 1024):
    """Pallas-backed forward of _FuzzyLayer.

    x:               [B, num_in] float32
    mu, sigma, mask: [num_in, maxmfs] float32 (mask: 1 = real mf, 0 = padding)

    layout="module": [B, num_in, maxmfs] (PyTorch module layout; one wrapper transpose).
    layout="native": [num_in, maxmfs, B] with no post-kernel transpose (preferred
                     for perf-critical pipelines; avoids re-streaming the output).
    out_dtype:       jnp.float32 (exact) or jnp.bfloat16 (halves store bytes).
    """
    B, num_in = x.shape
    maxmfs = mu.shape[1]
    P = num_in * maxmfs
    dsize = jnp.dtype(out_dtype).itemsize

    tb, grid_b, bp = _plan_batch_tiling(B, P, dsize, target_block_bytes)

    # Batch-invariant parameter tables, packed into ONE tiny resident VMEM input.
    mu_c = mu.astype(jnp.float32).reshape(P, 1)
    neg_inv2v = (-0.5 / (sigma.astype(jnp.float32) ** 2)).reshape(P, 1)
    mask_c = mask.astype(jnp.float32).reshape(P, 1)
    params = jnp.stack([mu_c, neg_inv2v, mask_c], axis=0)      # [3, P, 1]

    # Wrapper-side layout plumbing: batch on lanes.  (x is only 1/maxmfs of the
    # output bytes; doing this transpose in-kernel would need lane-padded
    # [tb, num_in] blocks that waste ~32x VMEM, so it stays in the wrapper.)
    # TODO(synk): feed x blocks in natural [B, num_in] order without VMEM lane
    # padding once a cheap in-kernel de-interleave is available.
    xt = x.astype(jnp.float32).T                               # [num_in, B]
    if bp != B:
        xt = jnp.pad(xt, ((0, 0), (0, bp - B)))                # skipped when B % tb == 0

    # VMEM budget from actual block sizes (double-buffered IO + f32 temporaries);
    # stays well under v7x's 64 MiB physical VMEM.
    x_blk = _round_up(num_in, 8) * tb * 4
    o_blk = _round_up(P, 8) * tb * dsize
    tmp = 6 * _round_up(P, 8) * tb * 4
    params_vmem = 3 * _round_up(P, 8) * 128 * 4
    vmem_need = 2 * (x_blk + o_blk) + tmp + params_vmem + (1 << 20)
    vmem_limit = int(min(max(vmem_need, 16 << 20), 32 << 20))

    kernel = functools.partial(_fuzzy_layer_kernel, num_in=num_in, maxmfs=maxmfs)
    out = pl.pallas_call(
        kernel,
        out_shape=jax.ShapeDtypeStruct((P, bp), out_dtype),
        grid_spec=pltpu.PrefetchScalarGridSpec(
            num_scalar_prefetch=0,
            grid=(grid_b,),
            in_specs=[
                pl.BlockSpec((num_in, tb), lambda b: (0, b)),    # x tile (batch on lanes)
                pl.BlockSpec((3, P, 1), lambda b: (0, 0, 0)),    # packed params (resident)
            ],
            out_specs=pl.BlockSpec((P, tb), lambda b: (0, b)),   # dense-sublane output
        ),
        compiler_params=pltpu.CompilerParams(
            dimension_semantics=("parallel",),
            vmem_limit_bytes=vmem_limit,
        ),
    )(xt, params)

    out = out[:, :B] if bp != B else out
    out = out.reshape(num_in, maxmfs, B)                       # free (contiguous) reshape
    if layout == "native":
        return out
    # Module-compatible layout [B, num_in, maxmfs].  This transpose re-streams the
    # output through HBM; use layout="native" downstream when throughput matters.
    return jnp.transpose(out, (2, 0, 1))


def make_fuzzy_layer_params(mfs_per_var, mu_lo=-2.0, mu_hi=2.0):
    """Deterministic Gaussian MF parameters, one row per input variable.

    mfs_per_var: list[int], number of membership functions per variable.
    Returns (mu, sigma, mask) each of shape [num_in, maxmfs] float32.
    """
    maxmfs = max(mfs_per_var)
    mu_rows, sigma_rows, mask_rows = [], [], []
    for i, n in enumerate(mfs_per_var):
        centers = jnp.linspace(mu_lo, mu_hi, n) + 0.1 * i
        mu_row = jnp.concatenate([centers, jnp.zeros((maxmfs - n,))])
        sigma_row = jnp.concatenate(
            [jnp.full((n,), 0.75 + 0.05 * i), jnp.ones((maxmfs - n,))])
        mask_row = jnp.concatenate([jnp.ones((n,)), jnp.zeros((maxmfs - n,))])
        mu_rows.append(mu_row)
        sigma_rows.append(sigma_row)
        mask_rows.append(mask_row)
    mu = jnp.stack(mu_rows).astype(jnp.float32)
    sigma = jnp.stack(sigma_rows).astype(jnp.float32)
    mask = jnp.stack(mask_rows).astype(jnp.float32)
    return mu, sigma, mask


def fuzzy_layer_reference(x, mu, sigma, mask):
    """Pure-JAX reference mirroring the PyTorch forward."""
    diff = x[:, :, None] - mu[None, :, :]
    return jnp.exp(-(diff ** 2) / (2.0 * sigma[None, :, :] ** 2)) * mask[None, :, :]


if __name__ == "__main__":
    # Small shapes consistent with the module: batch=16, num_in=4 variables,
    # per-variable mf counts [3, 2, 4, 3] -> maxmfs=4 (variables 0, 1, 3 padded).
    B = 16
    mfs_per_var = [3, 2, 4, 3]
    num_in = len(mfs_per_var)
    maxmfs = max(mfs_per_var)

    key = jax.random.PRNGKey(0)
    x = jax.random.normal(key, (B, num_in), dtype=jnp.float32)
    mu, sigma, mask = make_fuzzy_layer_params(mfs_per_var)

    y_ref = fuzzy_layer_reference(x, mu, sigma, mask)

    # Module-layout path (matches the PyTorch forward exactly).
    y = jax.block_until_ready(fuzzy_layer_forward(x, mu, sigma, mask))
    assert y.shape == (B, num_in, maxmfs)
    assert jnp.allclose(y, y_ref, atol=1e-5, rtol=1e-5), "module-layout mismatch"

    # Native-layout path (no post-kernel transpose).
    y_nat = jax.block_until_ready(
        fuzzy_layer_forward(x, mu, sigma, mask, layout="native"))
    assert y_nat.shape == (num_in, maxmfs, B)
    assert jnp.allclose(jnp.transpose(y_nat, (2, 0, 1)), y_ref,
                        atol=1e-5, rtol=1e-5), "native-layout mismatch"

    print("KERNEL_OK")
</pallas_src>

<mosaic_0001>
module attributes {stable_mosaic.version = 11 : i64} {
  func.func @_fuzzy_layer_kernel(%arg0: i32, %arg1: memref<4x128xf32, #tpu.memory_space<vmem>>, %arg2: memref<3x16x1xf32, #tpu.memory_space<vmem>>, %arg3: memref<16x128xf32, #tpu.memory_space<vmem>>) attributes {dimension_semantics = [#tpu.dimension_semantics<parallel>], iteration_bounds = array<i64: 1>, scalar_prefetch = 0 : i64, scratch_operands = 0 : i64, tpu.core_type = #tpu.core_type<tc>, window_params = [{transform_indices = @transform_0, window_bounds = array<i64: 4, 128>}, {pipeline_mode = #tpu.pipeline_mode<synchronous>, transform_indices = @transform_1, window_bounds = array<i64: 3, 16, 1>}, {transform_indices = @transform_2, window_bounds = array<i64: 16, 128>}]} {
    %c0 = arith.constant 0 : index
    %c0_0 = arith.constant 0 : index
    %0 = vector.load %arg1[%c0, %c0_0] : memref<4x128xf32, #tpu.memory_space<vmem>>, vector<4x128xf32>
    %1 = vector.extract_strided_slice %0 {offsets = [0, 0], sizes = [1, 128], strides = [1, 1]} : vector<4x128xf32> to vector<1x128xf32>
    %2 = vector.shape_cast %1 : vector<1x128xf32> to vector<1x128xf32>
    %3 = vector.broadcast %2 : vector<1x128xf32> to vector<4x128xf32>
    %4 = vector.extract_strided_slice %0 {offsets = [1, 0], sizes = [1, 128], strides = [1, 1]} : vector<4x128xf32> to vector<1x128xf32>
    %5 = vector.shape_cast %4 : vector<1x128xf32> to vector<1x128xf32>
    %6 = vector.broadcast %5 : vector<1x128xf32> to vector<4x128xf32>
    %7 = vector.extract_strided_slice %0 {offsets = [2, 0], sizes = [1, 128], strides = [1, 1]} : vector<4x128xf32> to vector<1x128xf32>
    %8 = vector.shape_cast %7 : vector<1x128xf32> to vector<1x128xf32>
    %9 = vector.broadcast %8 : vector<1x128xf32> to vector<4x128xf32>
    %10 = vector.extract_strided_slice %0 {offsets = [3, 0], sizes = [1, 128], strides = [1, 1]} : vector<4x128xf32> to vector<1x128xf32>
    %11 = vector.shape_cast %10 : vector<1x128xf32> to vector<1x128xf32>
    %12 = vector.broadcast %11 : vector<1x128xf32> to vector<4x128xf32>
    %13 = tpu.concatenate %3, %6, %9, %12 in 0 : vector<4x128xf32>, vector<4x128xf32>, vector<4x128xf32>, vector<4x128xf32> -> vector<16x128xf32>
    %c0_1 = arith.constant 0 : index
    %c0_2 = arith.constant 0 : index
    %c0_3 = arith.constant 0 : index
    %14 = vector.load %arg2[%c0_1, %c0_2, %c0_3] : memref<3x16x1xf32, #tpu.memory_space<vmem>>, vector<1x16x1xf32>
    %15 = vector.shape_cast %14 : vector<1x16x1xf32> to vector<16x1xf32>
    %c1 = arith.constant 1 : index
    %c0_4 = arith.constant 0 : index
    %c0_5 = arith.constant 0 : index
    %16 = vector.load %arg2[%c1, %c0_4, %c0_5] : memref<3x16x1xf32, #tpu.memory_space<vmem>>, vector<1x16x1xf32>
    %17 = vector.shape_cast %16 : vector<1x16x1xf32> to vector<16x1xf32>
    %c2 = arith.constant 2 : index
    %c0_6 = arith.constant 0 : index
    %c0_7 = arith.constant 0 : index
    %18 = vector.load %arg2[%c2, %c0_6, %c0_7] : memref<3x16x1xf32, #tpu.memory_space<vmem>>, vector<1x16x1xf32>
    %19 = vector.shape_cast %18 : vector<1x16x1xf32> to vector<16x1xf32>
    %20 = vector.broadcast %15 : vector<16x1xf32> to vector<16x128xf32>
    %21 = arith.subf %13, %20 : vector<16x128xf32>
    %22 = arith.mulf %21, %21 : vector<16x128xf32>
    %23 = vector.broadcast %17 : vector<16x1xf32> to vector<16x128xf32>
    %24 = arith.mulf %22, %23 : vector<16x128xf32>
    %25 = math.exp %24 : vector<16x128xf32>
    %26 = vector.broadcast %19 : vector<16x1xf32> to vector<16x128xf32>
    %27 = arith.mulf %25, %26 : vector<16x128xf32>
    %c0_8 = arith.constant 0 : index
    %c0_9 = arith.constant 0 : index
    %28 = vector.load %arg3[%c0_8, %c0_9] : memref<16x128xf32, #tpu.memory_space<vmem>>, vector<16x128xf32>
    tpu.vector_store %arg3[%c0_8, %c0_9], %27 {strides = array<i32>} : memref<16x128xf32, #tpu.memory_space<vmem>>, vector<16x128xf32>,
    return
  }
  func.func @transform_0(%arg0: i32) -> (i32, i32) {
    %c0_i32 = arith.constant 0 : i32
    %c0_i32_0 = arith.constant 0 : i32
    return %c0_i32, %arg0 : i32, i32
  }
  func.func @transform_1(%arg0: i32) -> (i32, i32, i32) {
    %c0_i32 = arith.constant 0 : i32
    %c0_i32_0 = arith.constant 0 : i32
    %c0_i32_1 = arith.constant 0 : i32
    %c0_i32_2 = arith.constant 0 : i32
    return %c0_i32, %c0_i32_0, %c0_i32_1 : i32, i32, i32
  }
  func.func @transform_2(%arg0: i32) -> (i32, i32) {
    %c0_i32 = arith.constant 0 : i32
    %c0_i32_0 = arith.constant 0 : i32
    return %c0_i32, %arg0 : i32, i32
  }
}

</mosaic_0001>

<bundles_post_ra>
// kernel: fuzzy_layer_forward.1
= control target key start
LH: loop header
LB: loop body
LE: loop exit
PB: predicated region body
PF: predicated region fallthrough
CT: control target
= control target key end

     0   :  { %v138_v2 = vmov 0   ;;  %s190_s0 = inlined_call_operand.vmem [shape: f32[4,128], index: 0, kind: input, shape index: {}]   ;;  %s191_s1 = inlined_call_operand.vmem [shape: f32[3,16,1], index: 1, kind: input, shape index: {}]   ;;  %s192_s2 = inlined_call_operand.hbm [shape: f32[16,128], index: 2, kind: output, shape index: {}]  }
   0x1   :  { %v100_v0 = vld [vmem:[%s191_s1 + $0x10] sm:$0xff]  ;;  %v32_v1 = vld [vmem:[%s191_s1] sm:$0xff]  ;;  %109 = vset.pattern.permute.xlu1 %v138_v2  ;;  %108 = vset.pattern.permute.xlu0 %v138_v2 }
   0x2   :  { %56 = vperm.xlu1 %109, %v100_v0   ;;  %42 = vperm.xlu0 %108, %v32_v1  }
   0x3   :  { %7 = vsyncpa [#allocation3], 0  ;;  %v101_v3 = vld [vmem:[%s191_s1 + $0x18] sm:$0xff]  ;;  %v33_v4 = vld [vmem:[%s191_s1 + $0x8] sm:$0xff]  ;;  %v13_v7 = vlaneseq  ;;  %vm29_vm0 = vcmask 1043456  }
   0x4   :  { %v103_v5 = vld [vmem:[%s191_s1 + $0x28] sm:$0xff]  ;;  %v102_v6 = vld [vmem:[%s191_s1 + $0x20] sm:$0xff] }
   0x5   :  { %v14_v8 = vshrl.u32 %v13_v7, 7  ;;  %v12_v11 = vld [vmem:[%s190_s0] sm:$0xf]  ;;  %s139_s0 = smov [#allocation2]  }
   0x6   :  { %61 = vperm.xlu1 %109, %v101_v3   ;;  %47 = vperm.xlu0 %108, %v33_v4   ;;  %s89_s1 = sshll.u32 %s139_s0, 4  ;;  %s90_s1 = int_to_ptr.vmem [resolvable:$true] %s89_s1 }
   0x7   :  { %v15_v9 = vsub.s32 0, %v14_v8  ;;  %v19_v10 = vsub.s32 1, %v14_v8  ;;  %v23_v14 = vsub.s32 2, %v14_v8  ;;  %v27_v15 = vsub.s32 3, %v14_v8  ;;  %s114_s23 = scalar_lea.vmem %s90_s1, 256  ;;  %p119_p1 = scmp.lt.s32.totalorder %s90_s1, %s90_s1 }
   0x8   :  { %p115_p0 = scmp.ne.s32.totalorder %s90_s1, %s114_s23  ;;  %p120_p2 = scmp.lt.s32.totalorder %s114_s23, %s114_s23 }
   0x9   :  { %v16_v12 = vrot.slane %v12_v11, %v15_v9  ;;  %v20_v13 = vrot.slane %v12_v11, %v19_v10  ;;  %v24_v17 = vrot.slane %v12_v11, %v23_v14  ;;  %v28_v18 = vrot.slane %v12_v11, %v27_v15 }
   0xa   :  { %77 = vperm.xlu1 %109, %v103_v5   ;;  %72 = vperm.xlu0 %108, %v102_v6   ;;  %p121_p3 = por %p120_p2, %p119_p1 }
   0xb   :  { %v30_v16 = vsel %vm29_vm0, %v16_v12, %v20_v13  ;;  %v31_v22 = vsel %vm29_vm0, %v24_v17, %v28_v18 }
   0xc   :  { %p122_p4 = pnand %p121_p3, %p115_p0 }
  0x81   :  { %v43_v19 = vpop.permute.xlu0 %42  ;;  %v57_v21 = vpop.permute.xlu1 %56 }
  0x82   :  { %v50_v20 = vsub.f32 %v30_v16, %v43_v19 }
  0x84   :  { %v52_v23 = vmul.f32 %v50_v20, %v50_v20 }
  0x85   :  { %v48_v24 = vpop.permute.xlu0 %47  ;;  %v62_v29 = vpop.permute.xlu1 %61 }
  0x86   :  { %v64_v25 = vmul.f32 %v57_v21, %v52_v23  ;;  %v51_v26 = vsub.f32 %v31_v22, %v48_v24 }
  0x88   :  { %v66_v27 = vmul.f32 1.442695, %v64_v25  ;;  %v53_v28 = vmul.f32 %v51_v26, %v51_v26 }
  0x89   :  { %v73_v33 = vpop.permute.xlu0 %72  ;;  %v78_v36 = vpop.permute.xlu1 %77 }
  0x8a   :  { %110 = vpow2.f32 %v66_v27  ;;  %v65_v30 = vmul.f32 %v62_v29, %v53_v28 }
  0x8c   :  { %v68_v31 = vmul.f32 1.442695, %v65_v30 }
  0x8e   :  { %112 = vpow2.f32 %v68_v31 }
  0x94   :  { %v111_v32 = vpop.eup %110 }
  0x95   :  { %v80_v34 = vmul.f32 %v111_v32, %v73_v33 }
  0x97   :  { %82 = vst [vmem:[#allocation2] sm:$0xff] %v80_v34 }
  0x98   :  { %v113_v35 = vpop.eup %112 }
  0x99   :  { %v81_v37 = vmul.f32 %v113_v35, %v78_v36 }
  0x9b   :  { %83 = vst [vmem:[#allocation2 + $0x8] sm:$0xff] %v81_v37 }
  0x9c   :  { %125 = shalt.err (!%p122_p4)
}
  0x9d   :  { %s126_s26 = scalar_lea.hbm %s192_s2, 256 }
  0x9e   :  { %p127_p5 = scmp.ne.s32.totalorder %s192_s2, %s126_s26  ;;  %p130_p6 = scmp.lt.u32.totalorder %s126_s26, %s192_s2 }
  0xa0   :  { %p132_p7 = pnand %p130_p6, %p127_p5 }
  0xa2   :  { %135 = shalt.err (!%p132_p7)
}
  0xa3   :  { %s140_s3 = smov 128   ;;  %s141_s4 = smov 8  }
  0xa4   :  { %95 = dma.vmem_to_hbm [thread:$0]  %s90_s1, 256, %s192_s2, [#allocation3], %s140_s3, %s140_s3, %s141_s4  }
  0xa5   :  { %136 = dma.done.wait [#allocation3], 256  }
  0xa6   :  { %137 = vsyncadd [#allocation3], 4294967040 }
  0xa7   :  { %99 = vsyncpa [#allocation3], 1 }

</bundles_post_ra>
